<compile_context>
chip_gen: v7x
topology: tpu7x:2x2x1
jax: 0.10.0
libtpu: 0.0.40
codegen_flags: <defaults>
</compile_context>

<pallas_src>
import jax
import jax.numpy as jnp
from jax.experimental import pallas as pl
from jax.experimental.pallas import tpu as pltpu

LANE = 128          # vreg lane width — the batch tile is a multiple of this
SUBLANE_F32 = 8     # f32 sublane granularity
SUBLANE_BF16 = 16   # bf16 sublane granularity


def _round_up(n, m):
    return ((n + m - 1) // m) * m


def mlp_kernel(xT_ref, w1_ref, b1_ref, w2_ref, b2_ref, w3_ref, b3_ref, oT_ref):
    """Fused 3-layer MLP on one batch tile, feature-major layout.

    xT_ref : (in_p,  bc) f32   — batch on the 128-lane axis
    w*_ref : (fan_out_p, fan_in_p) bf16 — PyTorch (out, in) layout, zero-padded
    b*_ref : (fan_out_p, 1) f32 — column bias, broadcast along lanes
    oT_ref : (out_p, bc) f32
    """
    cd = w1_ref.dtype

    # Layer 1: Linear + ReLU  (bf16 MXU matmul, f32 accumulate, f32 elementwise)
    xT = xT_ref[...].astype(cd)                       # f32 -> bf16 cast in-kernel
    h1 = jnp.dot(w1_ref[...], xT, preferred_element_type=jnp.float32)
    h1 = jnp.maximum(h1 + b1_ref[...], 0.0)

    # Layer 2: Linear + ReLU
    h2 = jnp.dot(w2_ref[...], h1.astype(cd), preferred_element_type=jnp.float32)
    h2 = jnp.maximum(h2 + b2_ref[...], 0.0)

    # Layer 3: Linear (no activation)
    y = jnp.dot(w3_ref[...], h2.astype(cd), preferred_element_type=jnp.float32)
    oT_ref[...] = (y + b3_ref[...]).astype(oT_ref.dtype)


def init_params(key, input_size, hidden_size, output_size):
    """Deterministic init mirroring nn.Linear: W is (out_features, in_features),
    uniform(-1/sqrt(fan_in), 1/sqrt(fan_in)) like PyTorch's default."""
    def linear(k, fan_in, fan_out):
        kw, kb = jax.random.split(k)
        bound = 1.0 / jnp.sqrt(jnp.float32(fan_in))
        w = jax.random.uniform(kw, (fan_out, fan_in), jnp.float32, -bound, bound)
        b = jax.random.uniform(kb, (fan_out,), jnp.float32, -bound, bound)
        return w, b

    k1, k2, k3 = jax.random.split(key, 3)
    w1, b1 = linear(k1, input_size, hidden_size)
    w2, b2 = linear(k2, hidden_size, hidden_size)
    w3, b3 = linear(k3, hidden_size, output_size)
    return w1, b1, w2, b2, w3, b3


def prepare_params(params, compute_dtype=jnp.bfloat16):
    """One-time: zero-pad feature dims to sublane multiples (8/16 — NOT 128)
    and cast weights to the MXU dtype.  Biases stay f32 columns (fan_out, 1)."""
    w1, b1, w2, b2, w3, b3 = params
    in_f = w1.shape[1]
    hid = w1.shape[0]
    out_f = w3.shape[0]
    in_p = _round_up(in_f, SUBLANE_F32)
    hid_p = _round_up(hid, SUBLANE_BF16)
    out_p = _round_up(out_f, SUBLANE_F32)

    def pad_w(w, rows, cols):
        return (jnp.zeros((rows, cols), compute_dtype)
                .at[:w.shape[0], :w.shape[1]].set(w.astype(compute_dtype)))

    def pad_b(b, rows):
        return jnp.zeros((rows, 1), jnp.float32).at[:b.shape[0], 0].set(b)

    return dict(
        w1=pad_w(w1, hid_p, in_p), b1=pad_b(b1, hid_p),
        w2=pad_w(w2, hid_p, hid_p), b2=pad_b(b2, hid_p),
        w3=pad_w(w3, out_p, hid_p), b3=pad_b(b3, out_p),
        in_features=in_f, out_features=out_f,
        in_padded=in_p, hid_padded=hid_p, out_padded=out_p,
        compute_dtype=compute_dtype,
    )


def _choose_block_cols(batch, target):
    """Pick the batch-tile width: lane-dense (multiple of 128), clamped to the
    batch so small batches aren't inflated by padding, and split into >=2 grid
    steps whenever the batch allows it so v7x's two TensorCores both get work."""
    b128 = _round_up(batch, LANE)                    # minimum lane-padded batch
    bc = min(_round_up(target, LANE), b128)          # clamp to actual batch
    if b128 >= 2 * LANE and _round_up(batch, bc) // bc < 2:
        bc = _round_up(b128 // 2, LANE)              # guarantee >=2 grid steps
    return bc


def torch_mind_forward(x, prepped, *, block_cols=512):
    """Run the fused TorchMind MLP. x: (batch, input_size) f32 -> (batch, output_size) f32.

    block_cols: target batch rows per grid step (multiple of 128); clamped to
    the batch and split to keep >=2 grid steps.  Sweep 512/1024 for big batches.
    """
    batch, in_f = x.shape
    assert in_f == prepped["in_features"]
    in_p = prepped["in_padded"]
    hid_p = prepped["hid_padded"]
    out_p = prepped["out_padded"]
    cd = prepped["compute_dtype"]

    bc = _choose_block_cols(batch, block_cols)
    b_p = _round_up(batch, bc)

    # Feature-major input (in_p, b_p), still f32 (bf16 cast happens in-kernel).
    # Only materialize a zero-padded copy when shapes are not already aligned.
    xT = x.T
    if b_p != batch or in_p != in_f:
        xT = jnp.zeros((in_p, b_p), x.dtype).at[:in_f, :batch].set(xT)

    grid = (b_p // bc,)

    w_itemsize = jnp.dtype(cd).itemsize
    flops = 2 * b_p * (in_p * hid_p + hid_p * hid_p + hid_p * out_p)
    bytes_accessed = (
        b_p * in_p * 4                                                 # xT (f32)
        + (hid_p * in_p + hid_p * hid_p + out_p * hid_p) * w_itemsize  # weights
        + (2 * hid_p + out_p) * 4                                      # biases (f32)
        + b_p * out_p * 4                                              # yT (f32)
    )

    outT = pl.pallas_call(
        mlp_kernel,
        out_shape=jax.ShapeDtypeStruct((out_p, b_p), jnp.float32),
        grid=grid,
        in_specs=[
            pl.BlockSpec((in_p, bc), lambda i: (0, i)),       # xT tile streams
            pl.BlockSpec((hid_p, in_p), lambda i: (0, 0)),    # W1 VMEM-resident
            pl.BlockSpec((hid_p, 1), lambda i: (0, 0)),       # b1 resident
            pl.BlockSpec((hid_p, hid_p), lambda i: (0, 0)),   # W2 resident
            pl.BlockSpec((hid_p, 1), lambda i: (0, 0)),       # b2 resident
            pl.BlockSpec((out_p, hid_p), lambda i: (0, 0)),   # W3 resident
            pl.BlockSpec((out_p, 1), lambda i: (0, 0)),       # b3 resident
        ],
        out_specs=pl.BlockSpec((out_p, bc), lambda i: (0, i)),
        compiler_params=pltpu.CompilerParams(
            dimension_semantics=("parallel",)),               # megacore on v7x
        cost_estimate=pl.CostEstimate(
            flops=flops, transcendentals=0, bytes_accessed=bytes_accessed),
    )(xT, prepped["w1"], prepped["b1"], prepped["w2"], prepped["b2"],
      prepped["w3"], prepped["b3"])

    # Slice off feature/batch padding and return row-major (batch, out_features).
    return outT[:prepped["out_features"], :batch].T


def reference_forward(x, params, compute_dtype=jnp.bfloat16):
    """Pure-JAX reference with the same bf16-operand / f32-accumulate arithmetic."""
    w1, b1, w2, b2, w3, b3 = params
    cd = compute_dtype
    h1 = jnp.dot(x.astype(cd), w1.astype(cd).T, preferred_element_type=jnp.float32)
    h1 = jnp.maximum(h1 + b1, 0.0)
    h2 = jnp.dot(h1.astype(cd), w2.astype(cd).T, preferred_element_type=jnp.float32)
    h2 = jnp.maximum(h2 + b2, 0.0)
    y = jnp.dot(h2.astype(cd), w3.astype(cd).T, preferred_element_type=jnp.float32)
    return y + b3


if __name__ == "__main__":
    input_size, hidden_size, output_size = 32, 64, 16
    batch = 256   # with the clamped block_cols logic this becomes 2 tiles of 128

    key = jax.random.PRNGKey(0)
    kx, kp = jax.random.split(key)
    x = jax.random.normal(kx, (batch, input_size), dtype=jnp.float32)
    params = init_params(kp, input_size, hidden_size, output_size)
    prepped = prepare_params(params, compute_dtype=jnp.bfloat16)

    y = torch_mind_forward(x, prepped, block_cols=512)
    y = jax.block_until_ready(y)

    y_ref = reference_forward(x, params, compute_dtype=jnp.bfloat16)
    assert y.shape == (batch, output_size)
    max_err = float(jnp.max(jnp.abs(y - y_ref)))
    assert jnp.allclose(y, y_ref, atol=5e-3, rtol=5e-3), f"mismatch vs reference: {max_err}"

    print("KERNEL_OK")
</pallas_src>

<mosaic_0001>
module attributes {stable_mosaic.version = 11 : i64} {
  func.func @mlp_kernel(%arg0: i32, %arg1: memref<32x128xf32, #tpu.memory_space<vmem>>, %arg2: memref<64x32xbf16, #tpu.memory_space<vmem>>, %arg3: memref<64x1xf32, #tpu.memory_space<vmem>>, %arg4: memref<64x64xbf16, #tpu.memory_space<vmem>>, %arg5: memref<64x1xf32, #tpu.memory_space<vmem>>, %arg6: memref<16x64xbf16, #tpu.memory_space<vmem>>, %arg7: memref<16x1xf32, #tpu.memory_space<vmem>>, %arg8: memref<16x128xf32, #tpu.memory_space<vmem>>) attributes {dimension_semantics = [#tpu.dimension_semantics<parallel>], iteration_bounds = array<i64: 2>, scalar_prefetch = 0 : i64, scratch_operands = 0 : i64, tpu.core_type = #tpu.core_type<tc>, window_params = [{transform_indices = @transform_0, window_bounds = array<i64: 32, 128>}, {pipeline_mode = #tpu.pipeline_mode<synchronous>, transform_indices = @transform_1, window_bounds = array<i64: 64, 32>}, {pipeline_mode = #tpu.pipeline_mode<synchronous>, transform_indices = @transform_2, window_bounds = array<i64: 64, 1>}, {pipeline_mode = #tpu.pipeline_mode<synchronous>, transform_indices = @transform_3, window_bounds = array<i64: 64, 64>}, {pipeline_mode = #tpu.pipeline_mode<synchronous>, transform_indices = @transform_4, window_bounds = array<i64: 64, 1>}, {pipeline_mode = #tpu.pipeline_mode<synchronous>, transform_indices = @transform_5, window_bounds = array<i64: 16, 64>}, {pipeline_mode = #tpu.pipeline_mode<synchronous>, transform_indices = @transform_6, window_bounds = array<i64: 16, 1>}, {transform_indices = @transform_7, window_bounds = array<i64: 16, 128>}]} {
    %c0 = arith.constant 0 : index
    %c0_0 = arith.constant 0 : index
    %0 = vector.load %arg1[%c0, %c0_0] : memref<32x128xf32, #tpu.memory_space<vmem>>, vector<32x128xf32>
    %1 = arith.truncf %0 : vector<32x128xf32> to vector<32x128xbf16>
    %c0_1 = arith.constant 0 : index
    %c0_2 = arith.constant 0 : index
    %2 = vector.load %arg2[%c0_1, %c0_2] : memref<64x32xbf16, #tpu.memory_space<vmem>>, vector<64x32xbf16>
    %cst = arith.constant dense<0.000000e+00> : vector<64x128xf32>
    %3 = tpu.matmul %2, %1, %cst {dimension_numbers = #tpu.dot_dimension_numbers<[1], [0], [0], [1], [0, 0, 1, 1], [], []>} : vector<64x32xbf16>, vector<32x128xbf16>, vector<64x128xf32> -> vector<64x128xf32>
    %c0_3 = arith.constant 0 : index
    %c0_4 = arith.constant 0 : index
    %4 = vector.load %arg3[%c0_3, %c0_4] : memref<64x1xf32, #tpu.memory_space<vmem>>, vector<64x1xf32>
    %5 = vector.broadcast %4 : vector<64x1xf32> to vector<64x128xf32>
    %6 = arith.addf %3, %5 : vector<64x128xf32>
    %cst_5 = arith.constant 0.000000e+00 : f32
    %7 = vector.broadcast %cst_5 : f32 to vector<64x128xf32>
    %8 = arith.maximumf %6, %7 : vector<64x128xf32>
    %c0_6 = arith.constant 0 : index
    %c0_7 = arith.constant 0 : index
    %9 = vector.load %arg4[%c0_6, %c0_7] : memref<64x64xbf16, #tpu.memory_space<vmem>>, vector<64x64xbf16>
    %10 = arith.truncf %8 : vector<64x128xf32> to vector<64x128xbf16>
    %cst_8 = arith.constant dense<0.000000e+00> : vector<64x128xf32>
    %11 = tpu.matmul %9, %10, %cst_8 {dimension_numbers = #tpu.dot_dimension_numbers<[1], [0], [0], [1], [0, 0, 1, 1], [], []>} : vector<64x64xbf16>, vector<64x128xbf16>, vector<64x128xf32> -> vector<64x128xf32>
    %c0_9 = arith.constant 0 : index
    %c0_10 = arith.constant 0 : index
    %12 = vector.load %arg5[%c0_9, %c0_10] : memref<64x1xf32, #tpu.memory_space<vmem>>, vector<64x1xf32>
    %13 = vector.broadcast %12 : vector<64x1xf32> to vector<64x128xf32>
    %14 = arith.addf %11, %13 : vector<64x128xf32>
    %cst_11 = arith.constant 0.000000e+00 : f32
    %15 = vector.broadcast %cst_11 : f32 to vector<64x128xf32>
    %16 = arith.maximumf %14, %15 : vector<64x128xf32>
    %c0_12 = arith.constant 0 : index
    %c0_13 = arith.constant 0 : index
    %17 = vector.load %arg6[%c0_12, %c0_13] : memref<16x64xbf16, #tpu.memory_space<vmem>>, vector<16x64xbf16>
    %18 = arith.truncf %16 : vector<64x128xf32> to vector<64x128xbf16>
    %cst_14 = arith.constant dense<0.000000e+00> : vector<16x128xf32>
    %19 = tpu.matmul %17, %18, %cst_14 {dimension_numbers = #tpu.dot_dimension_numbers<[1], [0], [0], [1], [0, 0, 1, 1], [], []>} : vector<16x64xbf16>, vector<64x128xbf16>, vector<16x128xf32> -> vector<16x128xf32>
    %c0_15 = arith.constant 0 : index
    %c0_16 = arith.constant 0 : index
    %20 = vector.load %arg7[%c0_15, %c0_16] : memref<16x1xf32, #tpu.memory_space<vmem>>, vector<16x1xf32>
    %21 = vector.broadcast %20 : vector<16x1xf32> to vector<16x128xf32>
    %22 = arith.addf %19, %21 : vector<16x128xf32>
    %c0_17 = arith.constant 0 : index
    %c0_18 = arith.constant 0 : index
    %23 = vector.load %arg8[%c0_17, %c0_18] : memref<16x128xf32, #tpu.memory_space<vmem>>, vector<16x128xf32>
    tpu.vector_store %arg8[%c0_17, %c0_18], %22 {strides = array<i32>} : memref<16x128xf32, #tpu.memory_space<vmem>>, vector<16x128xf32>,
    return
  }
  func.func @transform_0(%arg0: i32) -> (i32, i32) {
    %c0_i32 = arith.constant 0 : i32
    %c0_i32_0 = arith.constant 0 : i32
    return %c0_i32, %arg0 : i32, i32
  }
  func.func @transform_1(%arg0: i32) -> (i32, i32) {
    %c0_i32 = arith.constant 0 : i32
    %c0_i32_0 = arith.constant 0 : i32
    %c0_i32_1 = arith.constant 0 : i32
    return %c0_i32, %c0_i32_0 : i32, i32
  }
  func.func @transform_2(%arg0: i32) -> (i32, i32) {
    %c0_i32 = arith.constant 0 : i32
    %c0_i32_0 = arith.constant 0 : i32
    %c0_i32_1 = arith.constant 0 : i32
    return %c0_i32, %c0_i32_0 : i32, i32
  }
  func.func @transform_3(%arg0: i32) -> (i32, i32) {
    %c0_i32 = arith.constant 0 : i32
    %c0_i32_0 = arith.constant 0 : i32
    %c0_i32_1 = arith.constant 0 : i32
    return %c0_i32, %c0_i32_0 : i32, i32
  }
  func.func @transform_4(%arg0: i32) -> (i32, i32) {
    %c0_i32 = arith.constant 0 : i32
    %c0_i32_0 = arith.constant 0 : i32
    %c0_i32_1 = arith.constant 0 : i32
    return %c0_i32, %c0_i32_0 : i32, i32
  }
  func.func @transform_5(%arg0: i32) -> (i32, i32) {
    %c0_i32 = arith.constant 0 : i32
    %c0_i32_0 = arith.constant 0 : i32
    %c0_i32_1 = arith.constant 0 : i32
    return %c0_i32, %c0_i32_0 : i32, i32
  }
  func.func @transform_6(%arg0: i32) -> (i32, i32) {
    %c0_i32 = arith.constant 0 : i32
    %c0_i32_0 = arith.constant 0 : i32
    %c0_i32_1 = arith.constant 0 : i32
    return %c0_i32, %c0_i32_0 : i32, i32
  }
  func.func @transform_7(%arg0: i32) -> (i32, i32) {
    %c0_i32 = arith.constant 0 : i32
    %c0_i32_0 = arith.constant 0 : i32
    return %c0_i32, %arg0 : i32, i32
  }
}

</mosaic_0001>

<bundles_post_ra>
// kernel: tpu_custom_call.1
= control target key start
LH: loop header
LB: loop body
LE: loop exit
PB: predicated region body
PF: predicated region fallthrough
CT: control target
= control target key end

     0   :  { %12 = vsyncpa [#allocation4], 0  ;;  %s1266_s0 = inlined_call_operand.vmem [shape: f32[32,256], index: 0, kind: input, shape index: {}]   ;;  %s1267_s1 = inlined_call_operand.vmem [shape: bf16[64,32], index: 1, kind: input, shape index: {}]   ;;  %s1268_s2 = inlined_call_operand.vmem [shape: f32[64,1], index: 2, kind: input, shape index: {}]   ;;  %s1269_s3 = inlined_call_operand.vmem [shape: bf16[64,64], index: 3, kind: input, shape index: {}]   ;;  %s1270_s4 = inlined_call_operand.vmem [shape: f32[64,1], index: 4, kind: input, shape index: {}]   ;;  %s1271_s5 = inlined_call_operand.vmem [shape: bf16[16,64], index: 5, kind: input, shape index: {}]   ;;  %s1272_s6 = inlined_call_operand.vmem [shape: f32[16,1], index: 6, kind: input, shape index: {}]   ;;  %s1273_s7 = inlined_call_operand.hbm [shape: f32[16,256], index: 7, kind: output, shape index: {}]  }
   0x1   :  { %14 = vsyncpa [#allocation4 + $0x1], 0  ;;  %s1064_s24 = smov 0   ;;  %s1066_s25 = smov 0  }
   0x2   :  { %s1068_s26 = smov 0   ;;  %s1070_s27 = smov 0  }
   0x3 LB: > { %s807_s28 = sadd.s32 4294967295, %s1015_s27   ;;  %s808_s29 = sadd.s32 4294967294, %s1015_s27   ;;  %s1015_s27 = sphi %s1070_s27, %s1279_s27   ;;  %s1011_s26 = sphi %s1068_s26, %s1278_s26   ;;  %s1007_s25 = sphi %s1066_s25, %s1277_s25   ;;  %s1003_s24 = sphi %s1064_s24, %s1276_s24  }
   0x4   : > { %s1087_s30 = sadd.s32 1, %s1015_s27   ;;  %s27_s8 = sadd.s32 1, %s1011_s26 }
   0x5   : > { %s24_s9 = ssub.s32 %s1015_s27, %s1087_s30  ;;  %p34_p0 = scmp.ne.s32.totalorder %s1011_s26, %s1007_s25 }
   0x6   : > { %p25_p1 = scmp.eq.s32.totalorder %s24_s9, 0  ;;  %p35_p2 = scmp.eq.s32.totalorder %s1015_s27, 0 }
   0x7   : > { %p190_p3 = scmp.eq.s32.totalorder %s807_s28, 1  ;;  %p195_p4 = scmp.ne.s32.totalorder %s1007_s25, %s1003_s24 }
   0x8   : > { %s1100_s10 = scalar_select %p25_p1, %s1011_s26, %s27_s8  }
   0x9   : > { %p36_p5 = por %p35_p2, %p34_p0  ;;  %p1102_p6 = por %p190_p3, %p34_p0 }
   0xa   : > { %p196_p7 = scmp.eq.s32.totalorder %s808_s29, 1  ;;  %p810_p9 = scmp.ge.s32.totalorder %s1015_s27, 2 }
   0xc   : > { %p1106_p8 = por %p196_p7, %p195_p4  ;;  %230 = sbr.rel (%p810_p9) target bundleno = 26 (0x1a), region = 40 }
  0x13   : > { %233 = sbr.rel (!%p36_p5) target bundleno = 26 (0x1a), region = 44  ;;  %s235_s13 = sand.u32 (%p36_p5), 1, %s1011_s26  }
  0x14   : > { %s812_s14 = sshll.u32 (%p36_p5), %s1015_s27, 3  ;;  %s811_s15 = sshll.u32 (%p36_p5), %s235_s13, 5 }
  0x15   : > { %s239_s18 = scalar_lea.vmem (%p36_p5), %s1266_s0, %s812_s14  ;;  %s237_s19 = scalar_lea.vmem (%p36_p5), [#allocation2], %s811_s15 }
  0x16   : > { %v273_v0 = vld [vmem:[%s239_s18] sm:$0xff] (%p36_p5)  ;;  %v275_v1 = vld [vmem:[%s239_s18 + $0x10] sm:$0xff] (%p36_p5) }
  0x17   : > { %v277_v2 = vld [vmem:[%s239_s18 + $0x20] sm:$0xff] (%p36_p5)  ;;  %274 = vst [vmem:[%s237_s19] sm:$0xff] (%p36_p5), %v273_v0  ;;  %276 = vst [vmem:[%s237_s19 + $0x8] sm:$0xff] (%p36_p5), %v275_v1  ;;  %v279_v3 = vld [vmem:[%s239_s18 + $0x30] sm:$0xff] (%p36_p5) }
  0x18   : > { %278 = vst [vmem:[%s237_s19 + $0x10] sm:$0xff] (%p36_p5), %v277_v2  ;;  %280 = vst [vmem:[%s237_s19 + $0x18] sm:$0xff] (%p36_p5), %v279_v3 }
  0x1a PF: > { %p813_p10 = scmp.ge.s32.totalorder %s1015_s27, 1  ;;  %p285_p11 = scmp.lt.s32.totalorder %s1015_s27, 3 }
  0x1c   : > { %p286_p12 = pnand %p813_p10, %p285_p11 }
  0x1d   : > { %s1121_s20 = sand.u32 (!%p286_p12), 1, %s1007_s25   ;;  %v944_v4 = vld [vmem:[%s1267_s1] sm:$0xff] (!%p286_p12)   ;;  %vm406_vm0 = vcmask (!%p286_p12), 261120   ;;  %v1017_v10 = vmov (!%p286_p12), 0   ;;  %v340_v13 = vld [vmem:[%s1268_s2 + $0x10] sm:$0xff] (!%p286_p12)  ;;  %v339_v14 = vld [vmem:[%s1268_s2 + $0x8] sm:$0xff] (!%p286_p12) }
  0x1e   : > { %289 = sbr.rel (%p286_p12) target bundleno = 748 (0x2ec), region = 82  ;;  %s814_s23 = sshll.u32 (!%p286_p12), %s1121_s20, 5  ;;  %861 = vmatprep.mubr.msk.bf16.mxu0 (!%p286_p12), %vm406_vm0, %v944_v4  ;;  %942 = vset.pattern.permute.xlu0 (!%p286_p12), %v1017_v10  ;;  %v338_v12 = vld [vmem:[%s1268_s2] sm:$0xff] (!%p286_p12)  ;;  %v341_v15 = vld [vmem:[%s1268_s2 + $0x18] sm:$0xff] (!%p286_p12)  ;;  %v945_v16 = vld [vmem:[%s1267_s1 + $0x8] sm:$0xff] (!%p286_p12)   ;;  %vm572_vm1 = vcmask (!%p286_p12), 523264  }
  0x1f   : > { %s294_s29 = scalar_lea.vmem (!%p286_p12), [#allocation2], %s814_s23  ;;  %943 = vset.pattern.permute.xlu1 (!%p286_p12), %v1017_v10  ;;  %348 = vperm.xlu0 (!%p286_p12), %942, %v338_v12   ;;  %v946_v17 = vld [vmem:[%s1267_s1 + $0x10] sm:$0xff] (!%p286_p12)   ;;  %v342_v18 = vld [vmem:[%s1268_s2 + $0x20] sm:$0xff] (!%p286_p12)  ;;  %v343_v19 = vld [vmem:[%s1268_s2 + $0x28] sm:$0xff] (!%p286_p12)  ;;  %vm1019_vm2 = vmmov (!%p286_p12), 0   ;;  %s815_s8 = sshll.u32 (!%p286_p12), %s1121_s20, 4 }
  0x20   : > { %v324_v5 = vld [vmem:[%s294_s29] sm:$0xff] (!%p286_p12)  ;;  %v325_v6 = vld [vmem:[%s294_s29 + $0x8] sm:$0xff] (!%p286_p12)  ;;  %v326_v7 = vld [vmem:[%s294_s29 + $0x10] sm:$0xff] (!%p286_p12)  ;;  %358 = vperm.xlu1 (!%p286_p12), %943, %v340_v13   ;;  %s322_s9 = scalar_lea.vmem (!%p286_p12), [#allocation3], %s815_s8  ;;  %s835_s14 = sshll.u32 (!%p286_p12), %s807_s28, 7 }
  0x21   : > { %v328_v8 = vpack.c.bf16 (!%p286_p12), %v325_v6, %v324_v5  ;;  %v327_v9 = vld [vmem:[%s294_s29 + $0x18] sm:$0xff] (!%p286_p12)  ;;  %v344_v20 = vld [vmem:[%s1268_s2 + $0x30] sm:$0xff] (!%p286_p12)  ;;  %v504_v23 = vld [vmem:[%s1270_s4] sm:$0xff] (!%p286_p12)  ;;  %s740_s13 = sshll.u32 (!%p286_p12), %s322_s9, 4  ;;  %s1222_s17 = scalar_lea.hbm (!%p286_p12), %s1273_s7, %s835_s14  ;;  %s1217_s13 = int_to_ptr.vmem [resolvable:$true] %s740_s13 }
  0x22   : > { %v329_v11 = vpack.c.bf16 (!%p286_p12), %v327_v9, %v326_v7  ;;  %v345_v21 = vld [vmem:[%s1268_s2 + $0x38] sm:$0xff] (!%p286_p12)  ;;  %v505_v24 = vld [vmem:[%s1270_s4 + $0x8] sm:$0xff] (!%p286_p12)  ;;  %v506_v25 = vld [vmem:[%s1270_s4 + $0x10] sm:$0xff] (!%p286_p12)  ;;  %v1018_v9 = vmov (!%p286_p12), 0.0   ;;  %s728_s28 = scalar_lea.sflag (!%p286_p12), [#allocation4], %s1121_s20  ;;  %s953_s18 = scalar_lea.vmem (!%p286_p12), %s1217_s13, 256 }
  0x23   : > { %857 = vmatprep.subr.bf16.mxu0 (!%p286_p12), %v328_v8  ;;  %353 = vperm.xlu0 (!%p286_p12), %942, %v339_v14   ;;  %v947_v22 = vld [vmem:[%s1267_s1 + $0x18] sm:$0xff] (!%p286_p12)   ;;  %v508_v27 = vld [vmem:[%s1270_s4 + $0x20] sm:$0xff] (!%p286_p12)  ;;  %v509_v28 = vld [vmem:[%s1270_s4 + $0x28] sm:$0xff] (!%p286_p12)  ;;  %p954_p13 = scmp.ne.s32.totalorder (!%p286_p12), %s1217_s13, %s953_s18  ;;  %s1020_s19 = smov (!%p286_p12), [#allocation3]  }
  0x24   : > { %858 = vmatpush3.bf16.msra.mxu0 (!%p286_p12), %v328_v8  ;;  %363 = vperm.xlu1 (!%p286_p12), %943, %v341_v15   ;;  %v507_v26 = vld [vmem:[%s1270_s4 + $0x18] sm:$0xff] (!%p286_p12)  ;;  %v510_v29 = vld [vmem:[%s1270_s4 + $0x30] sm:$0xff] (!%p286_p12)  ;;  %v664_v31 = vld [vmem:[%s1272_s6] sm:$0xff] (!%p286_p12)  ;;  %s957_s21 = sshll.u32 (!%p286_p12), %s1020_s19, 4  ;;  %s958_s21 = int_to_ptr.vmem [resolvable:$false] %s957_s21 }
  0x25   : > { %859 = vmatprep.subr.bf16.mxu0 %v329_v11  ;;  %v511_v30 = vld [vmem:[%s1270_s4 + $0x38] sm:$0xff]  ;;  %v665_v32 = vld [vmem:[%s1272_s6 + $0x8] sm:$0xff]  ;;  %v948_v33 = vld [vmem:[%s1269_s3] sm:$0xff]   ;;  %p955_p0 = pnand %p954_p13, %p1102_p6  ;;  %s959_s22 = scalar_lea.vmem %s958_s21, 512 }
  0x26   : > { %877 = vmatprep.mubr.msk.bf16.mxu1 %vm572_vm1, %v948_v33  ;;  %v949_v6 = vld [vmem:[%s1269_s3 + $0x8] sm:$0xff]   ;;  %v950_v7 = vld [vmem:[%s1269_s3 + $0x10] sm:$0xff]   ;;  %v951_v8 = vld [vmem:[%s1269_s3 + $0x18] sm:$0xff]   ;;  %p960_p2 = scmp.lt.s32.totalorder %s1217_s13, %s958_s21  ;;  %p961_p3 = scmp.lt.s32.totalorder %s959_s22, %s953_s18 }
  0x27   : > { %368 = vperm.xlu0 %942, %v342_v18   ;;  %p956_p1 = pneg %p955_p0 }
  0x28   : > { %860 = vmatpush3.bf16.msra.mxu0 %v329_v11  ;;  %373 = vperm.xlu1 %943, %v343_v19   ;;  %p962_p4 = por %p961_p3, %p960_p2 }
  0x29   : > { %885 = vmatprep.subr.bf16.mxu0 %v1018_v9 }
  0x2a   : > { %p963_p5 = pnand %p962_p4, %p956_p1 }
  0x2b   : > { %862 = vmatmul.mubr.msk.bf16.vlgmr.msra.gmra.mrb[0].mxu0 %vm406_vm0, %v945_v16  ;;  %378 = vperm.xlu0 %942, %v344_v20  }
  0x2c   : > { %865 = vmatprep.mubr.msk.bf16.mxu0 %vm406_vm0, %v946_v17  ;;  %383 = vperm.xlu1 %943, %v345_v21  }
  0x2f   : > { %514 = vperm.xlu0 %942, %v504_v23  }
  0x30   : > { %519 = vperm.xlu1 %943, %v505_v24  }
  0x33   : > { %866 = vmatmul.mubr.msk.bf16.gmra.mrb[4].mxu0 %vm406_vm0, %v947_v22  ;;  %524 = vperm.xlu0 %942, %v506_v25  }
  0x34   : > { %529 = vperm.xlu1 %943, %v507_v26   ;;  %893 = vmatprep.mubr.msk.bf16.mxu0 %vm1019_vm2, %v1018_v9 }
  0x37   : > { %534 = vperm.xlu0 %942, %v508_v27  }
  0x38   : > { %539 = vperm.xlu1 %943, %v509_v28  }
  0x3b   : > { %544 = vperm.xlu0 %942, %v510_v29  }
  0x3c   : > { %549 = vperm.xlu1 %943, %v511_v30  }
  0x3f   : > { %668 = vperm.xlu0 %942, %v664_v31  }
  0x40   : > { %673 = vperm.xlu1 %943, %v665_v32  }
  0x9e   : > { %v349_v34 = vpop.permute.xlu0 %348 }
  0x9f   : > { %v359_v35 = vpop.permute.xlu1 %358 }
  0xa2   : > { %v354_v36 = vpop.permute.xlu0 %353 }
  0xa3   : > { %v364_v37 = vpop.permute.xlu1 %363 }
  0xa6   : > { %v369_v41 = vpop.permute.xlu0 %368 }
  0xa7   : > { %v374_v46 = vpop.permute.xlu1 %373 }
  0xaa   : > { %v379_v53 = vpop.permute.xlu0 %378 }
  0xab   : > { %v384_v58 = vpop.permute.xlu1 %383 }
  0xae   : > { %v515_v10 = vpop.permute.xlu0 %514 }
  0xaf   : > { %v520_v11 = vpop.permute.xlu1 %519 }
  0xb2   : > { %v525_v12 = vpop.permute.xlu0 %524 }
  0xb3   : > { %v530_v13 = vpop.permute.xlu1 %529 }
  0xb6   : > { %v535_v17 = vpop.permute.xlu0 %534 }
  0xb7   : > { %v540_v22 = vpop.permute.xlu1 %539 }
  0xba   : > { %v545_v29 = vpop.permute.xlu0 %544 }
  0xfe   : > { %v863_v38 = vpop.f32.mrb[0].mxu0 }
  0xff   : > { %v462_v39 = vadd.f32 %v863_v38, %v359_v35  ;;  %v453_v40 = vpop.f32.mrb[1].mxu0 }
 0x100   : > { %v454_v42 = vadd.f32 %v453_v40, %v349_v34  ;;  %v864_v43 = vpop.f32.mrb[2].mxu0  ;;  %v550_v34 = vpop.permute.xlu1 %549 }
 0x101   : > { %v465_v44 = vadd.f32 %v864_v43, %v364_v37  ;;  %v456_v45 = vpop.f32.mrb[3].mxu0  ;;  %v486_v48 = vmax.f32 %v462_v39, 0.0 }
 0x102   : > { %v457_v47 = vadd.f32 %v456_v45, %v354_v36  ;;  %v484_v50 = vmax.f32 %v454_v42, 0.0 }
 0x103   : > { %v487_v49 = vmax.f32 %v465_v44, 0.0 }
 0x104   : > { %v485_v51 = vmax.f32 %v457_v47, 0.0  ;;  %v669_v47 = vpop.permute.xlu0 %668 }
 0x105   : > { %v501_v52 = vpack.c.bf16 %v487_v49, %v486_v48 }
 0x106   : > { %v867_v54 = vpop.f32.mrb[4].mxu0  ;;  %v500_v55 = vpack.c.bf16 %v485_v51, %v484_v50  ;;  %v674_v51 = vpop.permute.xlu1 %673 }
 0x107   : > { %v478_v56 = vadd.f32 %v867_v54, %v379_v53  ;;  %v469_v57 = vpop.f32.mrb[5].mxu0 }
 0x108   : > { %v470_v59 = vadd.f32 %v469_v57, %v369_v41  ;;  %v868_v60 = vpop.f32.mrb[6].mxu0  ;;  %869 = vmatprep.subr.bf16.mxu1 %v500_v55 }
 0x109   : > { %v481_v61 = vadd.f32 %v868_v60, %v384_v58  ;;  %v472_v62 = vpop.f32.mrb[7].mxu0  ;;  %870 = vmatpush3.bf16.msra.mxu1 %v500_v55  ;;  %v490_v0 = vmax.f32 %v478_v56, 0.0 }
 0x10a   : > { %v473_v63 = vadd.f32 %v472_v62, %v374_v46  ;;  %871 = vmatprep.subr.bf16.mxu1 %v501_v52  ;;  %v488_v2 = vmax.f32 %v470_v59, 0.0  ;;  %v952_v46 = vld [vmem:[%s1271_s5] sm:$0xff]  }
 0x10b   : > { %v491_v1 = vmax.f32 %v481_v61, 0.0 }
 0x10c   : > { %v489_v3 = vmax.f32 %v473_v63, 0.0 }
 0x10d   : > { %v503_v4 = vpack.c.bf16 %v491_v1, %v490_v0  ;;  %872 = vmatpush3.bf16.msra.mxu1 %v501_v52 }
 0x10e   : > { %v502_v5 = vpack.c.bf16 %v489_v3, %v488_v2 }
 0x110   : > { %873 = vmatprep.subr.bf16.mxu1 %v502_v5 }
 0x111   : > { %874 = vmatpush3.bf16.msra.mxu1 %v502_v5 }
 0x112   : > { %875 = vmatprep.subr.bf16.mxu1 %v503_v4 }
 0x115   : > { %876 = vmatpush3.bf16.msra.mxu1 %v503_v4 }
 0x118   : > { %878 = vmatmul.mubr.msk.bf16.vlgmr.msra.gmra.mrb[0].mxu1 %vm572_vm1, %v949_v6 }
 0x119   : > { %881 = vmatprep.mubr.msk.bf16.mxu1 %vm572_vm1, %v950_v7 }
 0x120   : > { %882 = vmatmul.mubr.msk.bf16.gmra.mrb[4].mxu1 %vm572_vm1, %v951_v8 }
 0x1eb   : > { %v879_v14 = vpop.f32.mrb[0].mxu1 }
 0x1ec   : > { %v628_v15 = vadd.f32 %v879_v14, %v525_v12  ;;  %v619_v16 = vpop.f32.mrb[1].mxu1 }
 0x1ed   : > { %v620_v18 = vadd.f32 %v619_v16, %v515_v10  ;;  %v880_v19 = vpop.f32.mrb[2].mxu1 }
 0x1ee   : > { %v631_v20 = vadd.f32 %v880_v19, %v530_v13  ;;  %v622_v21 = vpop.f32.mrb[3].mxu1  ;;  %v652_v24 = vmax.f32 %v628_v15, 0.0 }
 0x1ef   : > { %v623_v23 = vadd.f32 %v622_v21, %v520_v11  ;;  %v650_v26 = vmax.f32 %v620_v18, 0.0 }
 0x1f0   : > { %v653_v25 = vmax.f32 %v631_v20, 0.0 }
 0x1f1   : > { %v651_v27 = vmax.f32 %v623_v23, 0.0 }
 0x1f2   : > { %v661_v28 = vpack.c.bf16 %v653_v25, %v652_v24 }
 0x1f3   : > { %v660_v30 = vpack.c.bf16 %v651_v27, %v650_v26  ;;  %v883_v31 = vpop.f32.mrb[4].mxu1 }
 0x1f4   : > { %v644_v32 = vadd.f32 %v883_v31, %v545_v29  ;;  %v635_v33 = vpop.f32.mrb[5].mxu1 }
 0x1f5   : > { %v636_v35 = vadd.f32 %v635_v33, %v535_v17  ;;  %v884_v36 = vpop.f32.mrb[6].mxu1  ;;  %886 = vmatpush3.bf16.msra.mxu0 %v660_v30 }
 0x1f6   : > { %v647_v37 = vadd.f32 %v884_v36, %v550_v34  ;;  %v638_v38 = vpop.f32.mrb[7].mxu1  ;;  %887 = vmatprep.subr.bf16.mxu0 %v1018_v9  ;;  %v656_v40 = vmax.f32 %v644_v32, 0.0 }
 0x1f7   : > { %v639_v39 = vadd.f32 %v638_v38, %v540_v22  ;;  %v654_v42 = vmax.f32 %v636_v35, 0.0 }
 0x1f8   : > { %v657_v41 = vmax.f32 %v647_v37, 0.0 }
 0x1f9   : > { %v655_v43 = vmax.f32 %v639_v39, 0.0  ;;  %888 = vmatpush3.bf16.msra.mxu0 %v661_v28 }
 0x1fa   : > { %v663_v44 = vpack.c.bf16 %v657_v41, %v656_v40  ;;  %889 = vmatprep.subr.bf16.mxu0 %v1018_v9 }
 0x1fb   : > { %v662_v45 = vpack.c.bf16 %v655_v43, %v654_v42 }
 0x1fd   : > { %890 = vmatpush3.bf16.msra.mxu0 %v662_v45 }
 0x1fe   : > { %891 = vmatprep.subr.bf16.mxu0 %v1018_v9 }
 0x201   : > { %892 = vmatpush3.bf16.msra.mxu0 %v663_v44 }
 0x204   : > { %894 = vmatmul.mubr.msk.bf16.vlgmr.msra.gmra.mrb[8].mxu0 %vm572_vm1, %v952_v46 }
 0x2d7   : > { %v718_v48 = vpop.f32.mrb[8].mxu0 }
 0x2d8   : > { %v719_v49 = vadd.f32 %v718_v48, %v669_v47  ;;  %v895_v50 = vpop.f32.mrb[9].mxu0 }
 0x2d9   : > { %v721_v52 = vpop.f32.mrb[10].mxu0 }
 0x2da   : > { %725 = vst [vmem:[%s322_s9] sm:$0xff] %v719_v49  ;;  %v722_v53 = vadd.f32 %v721_v52, %v674_v51  ;;  %v896_v54 = vpop.f32.mrb[11].mxu0 }
 0x2dc   : > { %726 = vst [vmem:[%s322_s9 + $0x8] sm:$0xff] %v722_v53 }
 0x2dd   : > { %966 = shalt.err (!%p963_p5)
}
 0x2de   : > { %s967_s23 = scalar_lea.hbm %s1222_s17, 256  ;;  %s971_s9 = scalar_lea.hbm %s1273_s7, 512 }
 0x2df   : > { %p968_p7 = scmp.ne.s32.totalorder %s1222_s17, %s967_s23  ;;  %p972_p12 = scmp.lt.u32.totalorder %s1222_s17, %s1273_s7 }
 0x2e0   : > { %p973_p13 = scmp.lt.u32.totalorder %s971_s9, %s967_s23  ;;  %p975_p1 = scmp.lt.u32.totalorder %s967_s23, %s1222_s17 }
 0x2e1   : > { %p969_p10 = pnand %p968_p7, %p1102_p6 }
 0x2e2   : > { %p974_p0 = por %p973_p13, %p972_p12 }
 0x2e3   : > { %p970_p11 = pneg %p969_p10 }
 0x2e4   : > { %p976_p2 = por %p975_p1, %p974_p0 }
 0x2e6   : > { %p977_p3 = pnand %p976_p2, %p970_p11 }
 0x2e8   : > { %980 = shalt.err (!%p977_p3)
}
 0x2e9   : > { %s1021_s16 = smov 128   ;;  %s1022_s18 = smov 256  }
 0x2ea   : > { %s1023_s19 = smov 8  }
 0x2eb   : > { %897 = dma.vmem_to_hbm [thread:$0]  (%p1102_p6), %s1217_s13, 256, %s1222_s17, %s728_s28, %s1021_s16, %s1022_s18, %s1023_s19  }
 0x2ec PF: > { %s755_s21 = sand.u32 1, %s1003_s24   ;;  %p900_p4 = pnand %p810_p9, %p1106_p8 }
 0x2ed   : > { %s756_s22 = scalar_lea.sflag [#allocation4], %s755_s21 }
 0x2ee   : > { %998 = dma.done.wait (!%p900_p4), %s756_s22, 256  }
 0x2ef   : > { %1000 = vsyncadd (!%p900_p4), %s756_s22, 4294967040  ;;  %p17_p5 = scmp.ge.s32.totalorder %s1087_s30, 4   ;;  %s1276_s24 = smov %s1007_s25 }
 0x2f0   : > { %s1277_s25 = smov %s1011_s26  ;;  %s1278_s26 = smov %s1100_s10 }
 0x2f1   : > { %s1279_s27 = smov %s1087_s30  ;;  %19 = sbr.rel (!%p17_p5) target bundleno = 3 (0x3), region = 126 }
 0x2f8   :  { %761 = vsyncpa [#allocation4], 1 }
 0x2f9   :  { %763 = vsyncpa [#allocation4 + $0x1], 1 }

</bundles_post_ra>
